<compile_context>
chip_gen: v6e
topology: v6e:2x2x1
jax: 0.10.0
libtpu: 0.0.40
codegen_flags: <defaults>
</compile_context>

<pallas_src>
import enum
import functools
from types import SimpleNamespace

import jax
import jax.numpy as jnp
from jax.experimental import pallas as pl
from jax.experimental.pallas import tpu as pltpu  # noqa: F401  (TPU backend)

NUM_EMB = 128
LEAKY_SLOPE = 0.01  # PyTorch nn.LeakyReLU default
LANE = 128


def _leaky(x):
    return jnp.where(x > 0, x, LEAKY_SLOPE * x)


# ----------------------------------------------------------------------------
# Pallas kernels (whole-array blocks; all shapes here are tiny)
# ----------------------------------------------------------------------------
def _encoder_kernel(x_ref, wn_ref, bn_ref, assign_ref, cond_ref, wc_ref, bc_ref,
                    node_ref, graph_ref):
    # node embeddings: Linear + LeakyReLU (bf16 operands, f32 accumulate)
    node = jnp.dot(x_ref[...], wn_ref[...], preferred_element_type=jnp.float32) + bn_ref[...]
    node = _leaky(node)
    node_bf = node.astype(node_ref.dtype)
    node_ref[...] = node_bf
    # per-graph mean pooling as an MXU matmul; node_emb stays resident in VMEM
    pooled = jnp.dot(assign_ref[...], node_bf, preferred_element_type=jnp.float32)
    # conditioning embedding: Linear + LeakyReLU
    cond_e = jnp.dot(cond_ref[...], wc_ref[...], preferred_element_type=jnp.float32) + bc_ref[...]
    cond_e = _leaky(cond_e)
    # lane-dense [G, 2*NUM_EMB] graph embedding written directly (no wrapper concat)
    graph_ref[:, :NUM_EMB] = pooled.astype(graph_ref.dtype)
    graph_ref[:, NUM_EMB:] = cond_e.astype(graph_ref.dtype)


def _heads_kernel(x_ref, w_ref, b_ref, o_ref):
    # all heads of one graph part fused into a single wide, lane-dense matmul
    y = jnp.dot(x_ref[...], w_ref[...], preferred_element_type=jnp.float32) + b_ref[...]
    o_ref[...] = y.astype(o_ref.dtype)


def _pair_heads_kernel(a_ref, b_ref, wt_ref, wb_ref, bias_ref, o_ref):
    # concat([a, b], 1) @ W == a @ W_top + b @ W_bot  -> no [*, 2*NUM_EMB] HBM intermediate
    y = jnp.dot(a_ref[...], wt_ref[...], preferred_element_type=jnp.float32)
    y = y + jnp.dot(b_ref[...], wb_ref[...], preferred_element_type=jnp.float32)
    o_ref[...] = (y + bias_ref[...]).astype(o_ref.dtype)


def _logz_kernel(c_ref, w1_ref, b1_ref, w2_ref, b2_ref, w3_ref, b3_ref, o_ref):
    # Linear -> LeakyReLU -> Linear -> LeakyReLU -> Linear, all in one kernel
    h = jnp.dot(c_ref[...], w1_ref[...], preferred_element_type=jnp.float32) + b1_ref[...]
    h = _leaky(h)
    h = jnp.dot(h.astype(w2_ref.dtype), w2_ref[...], preferred_element_type=jnp.float32) + b2_ref[...]
    h = _leaky(h)
    y = jnp.dot(h.astype(w3_ref.dtype), w3_ref[...], preferred_element_type=jnp.float32) + b3_ref[...]
    o_ref[...] = y.astype(o_ref.dtype)


# ----------------------------------------------------------------------------
# pallas_call wrapper (whole-array blocks, grid=(1,))
# ----------------------------------------------------------------------------
def _full_spec(shape):
    nd = len(shape)
    return pl.BlockSpec(tuple(shape), lambda i, _n=nd: (0,) * _n)


def _run(kernel, inputs, out_shapes):
    """out_shapes: (shape, dtype) for a single output, or a list of such pairs."""
    single = not isinstance(out_shapes, list)
    outs = [out_shapes] if single else out_shapes
    res = pl.pallas_call(
        kernel,
        out_shape=[jax.ShapeDtypeStruct(tuple(s), d) for s, d in outs],
        grid=(1,),
        in_specs=[_full_spec(a.shape) for a in inputs],
        out_specs=[_full_spec(tuple(s)) for s, _ in outs],
    )(*inputs)
    return res[0] if single else res


# ----------------------------------------------------------------------------
# Action types / env context (synthetic, small)
# ----------------------------------------------------------------------------
class GraphActionType(enum.Enum):
    Stop = "stop"
    AddNode = "add_node"
    SetNodeAttr = "set_node_attr"
    AddEdge = "add_edge"
    SetEdgeAttr = "set_edge_attr"
    RemoveNode = "remove_node"
    RemoveNodeAttr = "remove_node_attr"
    RemoveEdge = "remove_edge"
    RemoveEdgeAttr = "remove_edge_attr"
    AddFirstReactant = "add_first_reactant"
    AddReactant = "add_reactant"
    ReactUni = "react_uni"
    ReactBi = "react_bi"
    BckReactUni = "bck_react_uni"
    BckReactBi = "bck_react_bi"
    BckRemoveFirstReactant = "bck_remove_first_reactant"

    @property
    def cname(self):
        return self.value


GAT = GraphActionType

ACTION_TYPE_TO_GRAPH_PART = {
    GAT.Stop: "graph", GAT.AddNode: "node", GAT.SetNodeAttr: "node",
    GAT.AddEdge: "non_edge", GAT.SetEdgeAttr: "edge", GAT.RemoveNode: "node",
    GAT.RemoveNodeAttr: "node", GAT.RemoveEdge: "edge", GAT.RemoveEdgeAttr: "edge",
    GAT.AddFirstReactant: "graph", GAT.ReactUni: "graph", GAT.ReactBi: "graph",
    GAT.AddReactant: "graph", GAT.BckReactUni: "graph", GAT.BckReactBi: "graph",
    GAT.BckRemoveFirstReactant: "graph",
}


def make_env_ctx():
    key = jax.random.PRNGKey(1234)
    bb_dim = 64
    num_blocks = 10
    return SimpleNamespace(
        num_node_dim=8,
        num_edge_dim=4,
        num_cond_dim=16,
        num_new_node_values=6,
        num_node_attr_logits=5,
        num_node_attrs=3,
        num_edge_attr_logits=4,
        num_edge_attrs=2,
        building_blocks_dim=bb_dim,
        num_unimolecular_rxns=4,
        num_bimolecular_rxns=3,
        building_blocks_embs=jax.random.normal(key, (num_blocks, bb_dim), jnp.float32) * 0.1,
        action_type_order=[GAT.Stop, GAT.AddNode, GAT.SetNodeAttr, GAT.AddEdge,
                           GAT.SetEdgeAttr, GAT.AddFirstReactant, GAT.ReactUni,
                           GAT.ReactBi, GAT.AddReactant],
        bck_action_type_order=[GAT.BckReactUni, GAT.BckReactBi, GAT.BckRemoveFirstReactant],
    )


def action_type_to_num_inputs_outputs(env_ctx):
    ne = NUM_EMB
    return {
        GAT.Stop: (ne * 2, 1),
        GAT.AddNode: (ne, env_ctx.num_new_node_values),
        GAT.SetNodeAttr: (ne, env_ctx.num_node_attr_logits),
        GAT.AddEdge: (ne * 2, 1),                       # (duplicate key bug fixed)
        GAT.SetEdgeAttr: (ne * 2, env_ctx.num_edge_attr_logits),
        GAT.RemoveNode: (ne, 1),
        GAT.RemoveNodeAttr: (ne, env_ctx.num_node_attrs - 1),
        GAT.RemoveEdge: (ne * 2, 1),
        GAT.RemoveEdgeAttr: (ne * 2, env_ctx.num_edge_attrs),
        GAT.AddFirstReactant: (ne * 2, env_ctx.building_blocks_dim),
        GAT.AddReactant: (ne * 2 + env_ctx.num_bimolecular_rxns, env_ctx.building_blocks_dim),
        GAT.ReactUni: (ne * 2, env_ctx.num_unimolecular_rxns),
        GAT.ReactBi: (ne * 2, env_ctx.num_bimolecular_rxns),
        GAT.BckReactUni: (ne * 2, env_ctx.num_unimolecular_rxns),
        GAT.BckReactBi: (ne * 2, env_ctx.num_bimolecular_rxns),
        GAT.BckRemoveFirstReactant: (ne * 2, 1),
    }


# ----------------------------------------------------------------------------
# Parameter init (deterministic, PyTorch-Linear-style uniform init)
# ----------------------------------------------------------------------------
def _init_linear(key, n_in, n_out):
    kw, kb = jax.random.split(key)
    lim = 1.0 / (n_in ** 0.5)
    w = jax.random.uniform(kw, (n_in, n_out), jnp.float32, -lim, lim)
    b = jax.random.uniform(kb, (n_out,), jnp.float32, -lim, lim)
    return w, b


def _build_fused_heads(env_ctx, params, action_types, include_graph_out):
    """Concatenate all heads of one graph part into a single padded, lane-dense W/b.

    AddFirstReactant / AddReactant fold their trailing `@ building_blocks_embs.T`
    directly into the head weight (exact algebraic identity)."""
    ae_t = env_ctx.building_blocks_embs.T.astype(jnp.float32)  # pre-transposed once, at init
    heads = []  # (name, part, W [n_in, n_out] f32, b [n_out] f32)
    for t in action_types:
        w, b = params["mlps"][t.cname]
        if t in (GAT.AddFirstReactant, GAT.AddReactant):
            w = w @ ae_t
            b = b @ ae_t
        heads.append((t.cname, ACTION_TYPE_TO_GRAPH_PART[t], w, b))
    if include_graph_out:
        wg, bg = params["emb2graph_out"]
        heads.append(("__graph_out__", "graph", wg, bg))

    by_part, slots = {}, {}
    for part in ("graph", "node", "edge", "non_edge"):
        sel = [(n, w, b) for (n, p, w, b) in heads if p == part]
        if not sel:
            continue
        ws, bs, off = [], [], 0
        for n, w, b in sel:
            slots[n] = (part, off, w.shape[1])
            off += w.shape[1]
            ws.append(w)
            bs.append(b)
        W = jnp.concatenate(ws, axis=1)
        bias = jnp.concatenate(bs, axis=0)
        pad = (-W.shape[1]) % LANE  # lane-dense output: pad to multiple of 128
        if pad:
            W = jnp.pad(W, ((0, 0), (0, pad)))
            bias = jnp.pad(bias, (0, pad))
        entry = {"bias": bias.reshape(1, -1).astype(jnp.float32)}
        if part in ("edge", "non_edge"):
            entry["w_top"] = W[:NUM_EMB].astype(jnp.bfloat16)
            entry["w_bot"] = W[NUM_EMB:].astype(jnp.bfloat16)
        else:
            entry["w"] = W.astype(jnp.bfloat16)
        by_part[part] = entry
    return {"by_part": by_part, "slots": slots}


def _prepare_packs(params, env_ctx, do_bck):
    f32, bf16 = jnp.float32, jnp.bfloat16
    wn, bn = params["node_enc"]
    wc, bc = params["cond_enc"]
    params["enc_pack"] = dict(
        wn=wn.astype(bf16), bn=bn.reshape(1, -1).astype(f32),
        wc=wc.astype(bf16), bc=bc.reshape(1, -1).astype(f32))
    (w1, b1), (w2, b2), (w3, b3) = params["logZ"]
    params["logZ_pack"] = dict(
        w1=w1.astype(bf16), b1=b1.reshape(1, -1).astype(f32),
        w2=w2.astype(bf16), b2=b2.reshape(1, -1).astype(f32),
        w3=w3.astype(bf16), b3=b3.reshape(1, -1).astype(f32))
    fwd_order = [t for t in env_ctx.action_type_order if t != GAT.AddReactant]
    params["fused_fwd"] = _build_fused_heads(env_ctx, params, fwd_order, include_graph_out=True)
    params["fused_bck"] = (_build_fused_heads(env_ctx, params,
                                              list(env_ctx.bck_action_type_order),
                                              include_graph_out=False)
                           if do_bck else None)
    return params


def init_params(env_ctx, key, outs=1, do_bck=False):
    params = {}
    keys = jax.random.split(key, 64)
    ki = iter(range(64))

    # stand-in GraphTransformer encoder params (see TODO at top)
    params["node_enc"] = _init_linear(keys[next(ki)], env_ctx.num_node_dim, NUM_EMB)
    params["cond_enc"] = _init_linear(keys[next(ki)], env_ctx.num_cond_dim, NUM_EMB)

    io = action_type_to_num_inputs_outputs(env_ctx)
    atypes = list(env_ctx.action_type_order) + (list(env_ctx.bck_action_type_order) if do_bck else [])
    params["mlps"] = {}
    for at in atypes:
        n_in, n_out = io[at]
        params["mlps"][at.cname] = _init_linear(keys[next(ki)], n_in, n_out)

    params["emb2graph_out"] = _init_linear(keys[next(ki)], NUM_EMB * 2, outs)
    cd = max(1, env_ctx.num_cond_dim)
    params["logZ"] = [
        _init_linear(keys[next(ki)], cd, NUM_EMB * 2),
        _init_linear(keys[next(ki)], NUM_EMB * 2, NUM_EMB * 2),
        _init_linear(keys[next(ki)], NUM_EMB * 2, 1),
    ]
    params["outs"] = outs
    return _prepare_packs(params, env_ctx, do_bck)


# ----------------------------------------------------------------------------
# Forward pass
# ----------------------------------------------------------------------------
def encode(params, g, cond):
    """Fused stand-in encoder: node emb + mean pool + cond emb in one kernel."""
    ep = params["enc_pack"]
    num_graphs = cond.shape[0]
    num_nodes = g["x"].shape[0]
    batch = g["batch"]
    # TODO(synk): replace dense one-hot mean-pool matrix with segment-sum for large N
    assign = (batch[None, :] == jnp.arange(num_graphs)[:, None]).astype(jnp.float32)
    assign = assign / jnp.maximum(assign.sum(axis=1, keepdims=True), 1.0)
    node_emb, graph_emb = _run(
        _encoder_kernel,
        [g["x"].astype(jnp.bfloat16), ep["wn"], ep["bn"],
         assign.astype(jnp.bfloat16),
         cond.astype(jnp.bfloat16), ep["wc"], ep["bc"]],
        [((num_nodes, NUM_EMB), jnp.bfloat16),
         ((num_graphs, 2 * NUM_EMB), jnp.bfloat16)])
    return node_emb, graph_emb


def _run_heads(fused, node_emb, graph_emb, g):
    """One fused lane-dense matmul kernel per graph part."""
    outs = {}
    by_part = fused["by_part"]
    if "graph" in by_part:
        e = by_part["graph"]
        outs["graph"] = _run(_heads_kernel, [graph_emb, e["w"], e["bias"]],
                             ((graph_emb.shape[0], e["w"].shape[1]), jnp.float32))
    if "node" in by_part:
        e = by_part["node"]
        outs["node"] = _run(_heads_kernel, [node_emb, e["w"], e["bias"]],
                            ((node_emb.shape[0], e["w"].shape[1]), jnp.float32))
    if "edge" in by_part:
        ei = g["edge_index"][:, ::2]
        a = node_emb[ei[0]]      # gathers stay as XLA glue (index arrays)
        b = node_emb[ei[1]]
        e = by_part["edge"]
        outs["edge"] = _run(_pair_heads_kernel,
                            [a, b, e["w_top"], e["w_bot"], e["bias"]],
                            ((a.shape[0], e["w_top"].shape[1]), jnp.float32))
    if "non_edge" in by_part:
        if "non_edge_index" not in g:
            raise ValueError("non_edge heads requested but graph has no non_edge_index")
        nei = g["non_edge_index"]
        a = node_emb[nei[0]]
        b = node_emb[nei[1]]
        e = by_part["non_edge"]
        outs["non_edge"] = _run(_pair_heads_kernel,
                                [a, b, e["w_top"], e["w_bot"], e["bias"]],
                                ((a.shape[0], e["w_top"].shape[1]), jnp.float32))
    return outs


def _slice_logits(fused, part_outs, order):
    logits = []
    for t in order:
        part, off, n = fused["slots"][t.cname]
        logits.append(part_outs[part][:, off:off + n])
    return logits


def forward(params, env_ctx, g, cond, do_bck=False):
    node_emb, graph_emb = encode(params, g, cond)

    fwd_fused = params["fused_fwd"]
    part_outs = _run_heads(fwd_fused, node_emb, graph_emb, g)

    fwd_order = [t for t in env_ctx.action_type_order if t != GAT.AddReactant]
    raw_logits = _slice_logits(fwd_fused, part_outs, fwd_order)

    _, go_off, go_n = fwd_fused["slots"]["__graph_out__"]
    graph_out = part_outs["graph"][:, go_off:go_off + go_n]

    if do_bck:
        bck_fused = params["fused_bck"]
        bck_outs = _run_heads(bck_fused, node_emb, graph_emb, g)
        bck_raw_logits = _slice_logits(bck_fused, bck_outs, list(env_ctx.bck_action_type_order))
        # TODO(synk): ActionCategorical wrapper / masks omitted; returning raw logits.
        return raw_logits, bck_raw_logits, graph_out

    # TODO(synk): ActionCategorical wrapper / masks omitted; returning raw logits.
    return raw_logits, graph_out


def logZ(params, cond_info):
    pk = params["logZ_pack"]
    return _run(_logz_kernel,
                [cond_info.astype(jnp.bfloat16),
                 pk["w1"], pk["b1"], pk["w2"], pk["b2"], pk["w3"], pk["b3"]],
                ((cond_info.shape[0], 1), jnp.float32))


# ----------------------------------------------------------------------------
# Main
# ----------------------------------------------------------------------------
if __name__ == "__main__":
    env_ctx = make_env_ctx()
    key = jax.random.PRNGKey(0)
    k_p, k_x, k_c = jax.random.split(key, 3)

    params = init_params(env_ctx, k_p, outs=1, do_bck=False)

    # tiny synthetic batched graph: 8 nodes across 2 graphs, 3 undirected edges
    # (stored twice, as PyG does -> forward uses edge_index[:, ::2]), 2 non-edges
    num_nodes, num_graphs = 8, 2
    x = jax.random.normal(k_x, (num_nodes, env_ctx.num_node_dim), jnp.float32)
    batch = jnp.array([0, 0, 0, 0, 1, 1, 1, 1], jnp.int32)
    edge_index = jnp.array([[0, 1, 1, 2, 4, 5],
                            [1, 0, 2, 1, 5, 4]], jnp.int32)      # [2, 2*E]
    non_edge_index = jnp.array([[0, 4],
                                [3, 7]], jnp.int32)              # [2, NE]
    cond = jax.random.normal(k_c, (num_graphs, env_ctx.num_cond_dim), jnp.float32)

    g = {"x": x, "batch": batch, "edge_index": edge_index, "non_edge_index": non_edge_index}

    forward_fn = jax.jit(functools.partial(forward, params, env_ctx))
    logz_fn = jax.jit(functools.partial(logZ, params))

    raw_logits, graph_out = forward_fn(g, cond)
    lz = logz_fn(cond)

    jax.block_until_ready(graph_out)
    for t in raw_logits:
        jax.block_until_ready(t)
    jax.block_until_ready(lz)

    print("KERNEL_OK")
</pallas_src>

<mosaic_0001>
module attributes {stable_mosaic.version = 11 : i64} {
  func.func @_pair_heads_kernel(%arg0: i32, %arg1: memref<3x128xbf16, #tpu.memory_space<vmem>>, %arg2: memref<3x128xbf16, #tpu.memory_space<vmem>>, %arg3: memref<128x128xbf16, #tpu.memory_space<vmem>>, %arg4: memref<128x128xbf16, #tpu.memory_space<vmem>>, %arg5: memref<1x128xf32, #tpu.memory_space<vmem>>, %arg6: memref<3x128xf32, #tpu.memory_space<vmem>>) attributes {dimension_semantics = [#tpu.dimension_semantics<arbitrary>], iteration_bounds = array<i64: 1>, scalar_prefetch = 0 : i64, scratch_operands = 0 : i64, tpu.core_type = #tpu.core_type<tc>, window_params = [{pipeline_mode = #tpu.pipeline_mode<synchronous>, transform_indices = @transform_0, window_bounds = array<i64: 3, 128>}, {pipeline_mode = #tpu.pipeline_mode<synchronous>, transform_indices = @transform_1, window_bounds = array<i64: 3, 128>}, {pipeline_mode = #tpu.pipeline_mode<synchronous>, transform_indices = @transform_2, window_bounds = array<i64: 128, 128>}, {pipeline_mode = #tpu.pipeline_mode<synchronous>, transform_indices = @transform_3, window_bounds = array<i64: 128, 128>}, {pipeline_mode = #tpu.pipeline_mode<synchronous>, transform_indices = @transform_4, window_bounds = array<i64: 1, 128>}, {pipeline_mode = #tpu.pipeline_mode<synchronous>, transform_indices = @transform_5, window_bounds = array<i64: 3, 128>}]} {
    %c0 = arith.constant 0 : index
    %c0_0 = arith.constant 0 : index
    %0 = vector.load %arg1[%c0, %c0_0] : memref<3x128xbf16, #tpu.memory_space<vmem>>, vector<3x128xbf16>
    %c0_1 = arith.constant 0 : index
    %c0_2 = arith.constant 0 : index
    %1 = vector.load %arg3[%c0_1, %c0_2] : memref<128x128xbf16, #tpu.memory_space<vmem>>, vector<128x128xbf16>
    %cst = arith.constant dense<0.000000e+00> : vector<3x128xf32>
    %2 = tpu.matmul %0, %1, %cst {dimension_numbers = #tpu.dot_dimension_numbers<[1], [0], [0], [1], [0, 0, 1, 1], [], []>} : vector<3x128xbf16>, vector<128x128xbf16>, vector<3x128xf32> -> vector<3x128xf32>
    %c0_3 = arith.constant 0 : index
    %c0_4 = arith.constant 0 : index
    %3 = vector.load %arg2[%c0_3, %c0_4] : memref<3x128xbf16, #tpu.memory_space<vmem>>, vector<3x128xbf16>
    %c0_5 = arith.constant 0 : index
    %c0_6 = arith.constant 0 : index
    %4 = vector.load %arg4[%c0_5, %c0_6] : memref<128x128xbf16, #tpu.memory_space<vmem>>, vector<128x128xbf16>
    %cst_7 = arith.constant dense<0.000000e+00> : vector<3x128xf32>
    %5 = tpu.matmul %3, %4, %cst_7 {dimension_numbers = #tpu.dot_dimension_numbers<[1], [0], [0], [1], [0, 0, 1, 1], [], []>} : vector<3x128xbf16>, vector<128x128xbf16>, vector<3x128xf32> -> vector<3x128xf32>
    %6 = arith.addf %2, %5 : vector<3x128xf32>
    %c0_8 = arith.constant 0 : index
    %c0_9 = arith.constant 0 : index
    %7 = vector.load %arg5[%c0_8, %c0_9] : memref<1x128xf32, #tpu.memory_space<vmem>>, vector<1x128xf32>
    %8 = vector.broadcast %7 : vector<1x128xf32> to vector<3x128xf32>
    %9 = arith.addf %6, %8 : vector<3x128xf32>
    %c0_10 = arith.constant 0 : index
    %c0_11 = arith.constant 0 : index
    %10 = vector.load %arg6[%c0_10, %c0_11] : memref<3x128xf32, #tpu.memory_space<vmem>>, vector<3x128xf32>
    tpu.vector_store %arg6[%c0_10, %c0_11], %9 {strides = array<i32>} : memref<3x128xf32, #tpu.memory_space<vmem>>, vector<3x128xf32>,
    return
  }
  func.func @transform_0(%arg0: i32) -> (i32, i32) {
    %c0_i32 = arith.constant 0 : i32
    %c0_i32_0 = arith.constant 0 : i32
    %c0_i32_1 = arith.constant 0 : i32
    return %c0_i32, %c0_i32_0 : i32, i32
  }
  func.func @transform_1(%arg0: i32) -> (i32, i32) {
    %c0_i32 = arith.constant 0 : i32
    %c0_i32_0 = arith.constant 0 : i32
    %c0_i32_1 = arith.constant 0 : i32
    return %c0_i32, %c0_i32_0 : i32, i32
  }
  func.func @transform_2(%arg0: i32) -> (i32, i32) {
    %c0_i32 = arith.constant 0 : i32
    %c0_i32_0 = arith.constant 0 : i32
    %c0_i32_1 = arith.constant 0 : i32
    return %c0_i32, %c0_i32_0 : i32, i32
  }
  func.func @transform_3(%arg0: i32) -> (i32, i32) {
    %c0_i32 = arith.constant 0 : i32
    %c0_i32_0 = arith.constant 0 : i32
    %c0_i32_1 = arith.constant 0 : i32
    return %c0_i32, %c0_i32_0 : i32, i32
  }
  func.func @transform_4(%arg0: i32) -> (i32, i32) {
    %c0_i32 = arith.constant 0 : i32
    %c0_i32_0 = arith.constant 0 : i32
    %c0_i32_1 = arith.constant 0 : i32
    return %c0_i32, %c0_i32_0 : i32, i32
  }
  func.func @transform_5(%arg0: i32) -> (i32, i32) {
    %c0_i32 = arith.constant 0 : i32
    %c0_i32_0 = arith.constant 0 : i32
    %c0_i32_1 = arith.constant 0 : i32
    return %c0_i32, %c0_i32_0 : i32, i32
  }
}

module attributes {stable_mosaic.version = 11 : i64} {
  func.func @_encoder_kernel(%arg0: i32, %arg1: memref<8x8xbf16, #tpu.memory_space<vmem>>, %arg2: memref<8x128xbf16, #tpu.memory_space<vmem>>, %arg3: memref<1x128xf32, #tpu.memory_space<vmem>>, %arg4: memref<2x8xbf16, #tpu.memory_space<vmem>>, %arg5: memref<2x16xbf16, #tpu.memory_space<vmem>>, %arg6: memref<16x128xbf16, #tpu.memory_space<vmem>>, %arg7: memref<1x128xf32, #tpu.memory_space<vmem>>, %arg8: memref<8x128xbf16, #tpu.memory_space<vmem>>, %arg9: memref<2x256xbf16, #tpu.memory_space<vmem>>) attributes {dimension_semantics = [#tpu.dimension_semantics<arbitrary>], iteration_bounds = array<i64: 1>, scalar_prefetch = 0 : i64, scratch_operands = 0 : i64, tpu.core_type = #tpu.core_type<tc>, window_params = [{pipeline_mode = #tpu.pipeline_mode<synchronous>, transform_indices = @transform_0, window_bounds = array<i64: 8, 8>}, {pipeline_mode = #tpu.pipeline_mode<synchronous>, transform_indices = @transform_1, window_bounds = array<i64: 8, 128>}, {pipeline_mode = #tpu.pipeline_mode<synchronous>, transform_indices = @transform_2, window_bounds = array<i64: 1, 128>}, {pipeline_mode = #tpu.pipeline_mode<synchronous>, transform_indices = @transform_3, window_bounds = array<i64: 2, 8>}, {pipeline_mode = #tpu.pipeline_mode<synchronous>, transform_indices = @transform_4, window_bounds = array<i64: 2, 16>}, {pipeline_mode = #tpu.pipeline_mode<synchronous>, transform_indices = @transform_5, window_bounds = array<i64: 16, 128>}, {pipeline_mode = #tpu.pipeline_mode<synchronous>, transform_indices = @transform_6, window_bounds = array<i64: 1, 128>}, {pipeline_mode = #tpu.pipeline_mode<synchronous>, transform_indices = @transform_7, window_bounds = array<i64: 8, 128>}, {pipeline_mode = #tpu.pipeline_mode<synchronous>, transform_indices = @transform_8, window_bounds = array<i64: 2, 256>}]} {
    %c0 = arith.constant 0 : index
    %c0_0 = arith.constant 0 : index
    %0 = vector.load %arg1[%c0, %c0_0] : memref<8x8xbf16, #tpu.memory_space<vmem>>, vector<8x8xbf16>
    %c0_1 = arith.constant 0 : index
    %c0_2 = arith.constant 0 : index
    %1 = vector.load %arg2[%c0_1, %c0_2] : memref<8x128xbf16, #tpu.memory_space<vmem>>, vector<8x128xbf16>
    %cst = arith.constant dense<0.000000e+00> : vector<8x128xf32>
    %2 = tpu.matmul %0, %1, %cst {dimension_numbers = #tpu.dot_dimension_numbers<[1], [0], [0], [1], [0, 0, 1, 1], [], []>} : vector<8x8xbf16>, vector<8x128xbf16>, vector<8x128xf32> -> vector<8x128xf32>
    %c0_3 = arith.constant 0 : index
    %c0_4 = arith.constant 0 : index
    %3 = vector.load %arg3[%c0_3, %c0_4] : memref<1x128xf32, #tpu.memory_space<vmem>>, vector<1x128xf32>
    %4 = vector.broadcast %3 : vector<1x128xf32> to vector<8x128xf32>
    %5 = arith.addf %2, %4 : vector<8x128xf32>
    %cst_5 = arith.constant 0.000000e+00 : f32
    %6 = vector.broadcast %cst_5 : f32 to vector<8x128xf32>
    %7 = arith.cmpf ogt, %5, %6 : vector<8x128xf32>
    %cst_6 = arith.constant 0.00999999977 : f32
    %8 = vector.broadcast %cst_6 : f32 to vector<8x128xf32>
    %9 = arith.mulf %8, %5 : vector<8x128xf32>
    %10 = arith.select %7, %5, %9 : vector<8x128xi1>, vector<8x128xf32>
    %11 = arith.truncf %10 : vector<8x128xf32> to vector<8x128xbf16>
    %c0_7 = arith.constant 0 : index
    %c0_8 = arith.constant 0 : index
    %12 = vector.load %arg8[%c0_7, %c0_8] : memref<8x128xbf16, #tpu.memory_space<vmem>>, vector<8x128xbf16>
    tpu.vector_store %arg8[%c0_7, %c0_8], %11 {strides = array<i32>} : memref<8x128xbf16, #tpu.memory_space<vmem>>, vector<8x128xbf16>,
    %c0_9 = arith.constant 0 : index
    %c0_10 = arith.constant 0 : index
    %13 = vector.load %arg4[%c0_9, %c0_10] : memref<2x8xbf16, #tpu.memory_space<vmem>>, vector<2x8xbf16>
    %cst_11 = arith.constant dense<0.000000e+00> : vector<2x128xf32>
    %14 = tpu.matmul %13, %11, %cst_11 {dimension_numbers = #tpu.dot_dimension_numbers<[1], [0], [0], [1], [0, 0, 1, 1], [], []>} : vector<2x8xbf16>, vector<8x128xbf16>, vector<2x128xf32> -> vector<2x128xf32>
    %c0_12 = arith.constant 0 : index
    %c0_13 = arith.constant 0 : index
    %15 = vector.load %arg5[%c0_12, %c0_13] : memref<2x16xbf16, #tpu.memory_space<vmem>>, vector<2x16xbf16>
    %c0_14 = arith.constant 0 : index
    %c0_15 = arith.constant 0 : index
    %16 = vector.load %arg6[%c0_14, %c0_15] : memref<16x128xbf16, #tpu.memory_space<vmem>>, vector<16x128xbf16>
    %cst_16 = arith.constant dense<0.000000e+00> : vector<2x128xf32>
    %17 = tpu.matmul %15, %16, %cst_16 {dimension_numbers = #tpu.dot_dimension_numbers<[1], [0], [0], [1], [0, 0, 1, 1], [], []>} : vector<2x16xbf16>, vector<16x128xbf16>, vector<2x128xf32> -> vector<2x128xf32>
    %c0_17 = arith.constant 0 : index
    %c0_18 = arith.constant 0 : index
    %18 = vector.load %arg7[%c0_17, %c0_18] : memref<1x128xf32, #tpu.memory_space<vmem>>, vector<1x128xf32>
    %19 = vector.broadcast %18 : vector<1x128xf32> to vector<2x128xf32>
    %20 = arith.addf %17, %19 : vector<2x128xf32>
    %cst_19 = arith.constant 0.000000e+00 : f32
    %21 = vector.broadcast %cst_19 : f32 to vector<2x128xf32>
    %22 = arith.cmpf ogt, %20, %21 : vector<2x128xf32>
    %cst_20 = arith.constant 0.00999999977 : f32
    %23 = vector.broadcast %cst_20 : f32 to vector<2x128xf32>
    %24 = arith.mulf %23, %20 : vector<2x128xf32>
    %25 = arith.select %22, %20, %24 : vector<2x128xi1>, vector<2x128xf32>
    %26 = arith.truncf %14 : vector<2x128xf32> to vector<2x128xbf16>
    %c0_21 = arith.constant 0 : index
    %c0_22 = arith.constant 0 : index
    %27 = vector.load %arg9[%c0_21, %c0_22] : memref<2x256xbf16, #tpu.memory_space<vmem>>, vector<2x128xbf16>
    tpu.vector_store %arg9[%c0_21, %c0_22], %26 {strides = array<i32>} : memref<2x256xbf16, #tpu.memory_space<vmem>>, vector<2x128xbf16>,
    %28 = arith.truncf %25 : vector<2x128xf32> to vector<2x128xbf16>
    %c0_23 = arith.constant 0 : index
    %c128 = arith.constant 128 : index
    %29 = vector.load %arg9[%c0_23, %c128] : memref<2x256xbf16, #tpu.memory_space<vmem>>, vector<2x128xbf16>
    tpu.vector_store %arg9[%c0_23, %c128], %28 {strides = array<i32>} : memref<2x256xbf16, #tpu.memory_space<vmem>>, vector<2x128xbf16>,
    return
  }
  func.func @transform_0(%arg0: i32) -> (i32, i32) {
    %c0_i32 = arith.constant 0 : i32
    %c0_i32_0 = arith.constant 0 : i32
    %c0_i32_1 = arith.constant 0 : i32
    return %c0_i32, %c0_i32_0 : i32, i32
  }
  func.func @transform_1(%arg0: i32) -> (i32, i32) {
    %c0_i32 = arith.constant 0 : i32
    %c0_i32_0 = arith.constant 0 : i32
    %c0_i32_1 = arith.constant 0 : i32
    return %c0_i32, %c0_i32_0 : i32, i32
  }
  func.func @transform_2(%arg0: i32) -> (i32, i32) {
    %c0_i32 = arith.constant 0 : i32
    %c0_i32_0 = arith.constant 0 : i32
    %c0_i32_1 = arith.constant 0 : i32
    return %c0_i32, %c0_i32_0 : i32, i32
  }
  func.func @transform_3(%arg0: i32) -> (i32, i32) {
    %c0_i32 = arith.constant 0 : i32
    %c0_i32_0 = arith.constant 0 : i32
    %c0_i32_1 = arith.constant 0 : i32
    return %c0_i32, %c0_i32_0 : i32, i32
  }
  func.func @transform_4(%arg0: i32) -> (i32, i32) {
    %c0_i32 = arith.constant 0 : i32
    %c0_i32_0 = arith.constant 0 : i32
    %c0_i32_1 = arith.constant 0 : i32
    return %c0_i32, %c0_i32_0 : i32, i32
  }
  func.func @transform_5(%arg0: i32) -> (i32, i32) {
    %c0_i32 = arith.constant 0 : i32
    %c0_i32_0 = arith.constant 0 : i32
    %c0_i32_1 = arith.constant 0 : i32
    return %c0_i32, %c0_i32_0 : i32, i32
  }
  func.func @transform_6(%arg0: i32) -> (i32, i32) {
    %c0_i32 = arith.constant 0 : i32
    %c0_i32_0 = arith.constant 0 : i32
    %c0_i32_1 = arith.constant 0 : i32
    return %c0_i32, %c0_i32_0 : i32, i32
  }
  func.func @transform_7(%arg0: i32) -> (i32, i32) {
    %c0_i32 = arith.constant 0 : i32
    %c0_i32_0 = arith.constant 0 : i32
    %c0_i32_1 = arith.constant 0 : i32
    return %c0_i32, %c0_i32_0 : i32, i32
  }
  func.func @transform_8(%arg0: i32) -> (i32, i32) {
    %c0_i32 = arith.constant 0 : i32
    %c0_i32_0 = arith.constant 0 : i32
    %c0_i32_1 = arith.constant 0 : i32
    return %c0_i32, %c0_i32_0 : i32, i32
  }
}

module attributes {stable_mosaic.version = 11 : i64} {
  func.func @_pair_heads_kernel(%arg0: i32, %arg1: memref<2x128xbf16, #tpu.memory_space<vmem>>, %arg2: memref<2x128xbf16, #tpu.memory_space<vmem>>, %arg3: memref<128x128xbf16, #tpu.memory_space<vmem>>, %arg4: memref<128x128xbf16, #tpu.memory_space<vmem>>, %arg5: memref<1x128xf32, #tpu.memory_space<vmem>>, %arg6: memref<2x128xf32, #tpu.memory_space<vmem>>) attributes {dimension_semantics = [#tpu.dimension_semantics<arbitrary>], iteration_bounds = array<i64: 1>, scalar_prefetch = 0 : i64, scratch_operands = 0 : i64, tpu.core_type = #tpu.core_type<tc>, window_params = [{pipeline_mode = #tpu.pipeline_mode<synchronous>, transform_indices = @transform_0, window_bounds = array<i64: 2, 128>}, {pipeline_mode = #tpu.pipeline_mode<synchronous>, transform_indices = @transform_1, window_bounds = array<i64: 2, 128>}, {pipeline_mode = #tpu.pipeline_mode<synchronous>, transform_indices = @transform_2, window_bounds = array<i64: 128, 128>}, {pipeline_mode = #tpu.pipeline_mode<synchronous>, transform_indices = @transform_3, window_bounds = array<i64: 128, 128>}, {pipeline_mode = #tpu.pipeline_mode<synchronous>, transform_indices = @transform_4, window_bounds = array<i64: 1, 128>}, {pipeline_mode = #tpu.pipeline_mode<synchronous>, transform_indices = @transform_5, window_bounds = array<i64: 2, 128>}]} {
    %c0 = arith.constant 0 : index
    %c0_0 = arith.constant 0 : index
    %0 = vector.load %arg1[%c0, %c0_0] : memref<2x128xbf16, #tpu.memory_space<vmem>>, vector<2x128xbf16>
    %c0_1 = arith.constant 0 : index
    %c0_2 = arith.constant 0 : index
    %1 = vector.load %arg3[%c0_1, %c0_2] : memref<128x128xbf16, #tpu.memory_space<vmem>>, vector<128x128xbf16>
    %cst = arith.constant dense<0.000000e+00> : vector<2x128xf32>
    %2 = tpu.matmul %0, %1, %cst {dimension_numbers = #tpu.dot_dimension_numbers<[1], [0], [0], [1], [0, 0, 1, 1], [], []>} : vector<2x128xbf16>, vector<128x128xbf16>, vector<2x128xf32> -> vector<2x128xf32>
    %c0_3 = arith.constant 0 : index
    %c0_4 = arith.constant 0 : index
    %3 = vector.load %arg2[%c0_3, %c0_4] : memref<2x128xbf16, #tpu.memory_space<vmem>>, vector<2x128xbf16>
    %c0_5 = arith.constant 0 : index
    %c0_6 = arith.constant 0 : index
    %4 = vector.load %arg4[%c0_5, %c0_6] : memref<128x128xbf16, #tpu.memory_space<vmem>>, vector<128x128xbf16>
    %cst_7 = arith.constant dense<0.000000e+00> : vector<2x128xf32>
    %5 = tpu.matmul %3, %4, %cst_7 {dimension_numbers = #tpu.dot_dimension_numbers<[1], [0], [0], [1], [0, 0, 1, 1], [], []>} : vector<2x128xbf16>, vector<128x128xbf16>, vector<2x128xf32> -> vector<2x128xf32>
    %6 = arith.addf %2, %5 : vector<2x128xf32>
    %c0_8 = arith.constant 0 : index
    %c0_9 = arith.constant 0 : index
    %7 = vector.load %arg5[%c0_8, %c0_9] : memref<1x128xf32, #tpu.memory_space<vmem>>, vector<1x128xf32>
    %8 = vector.broadcast %7 : vector<1x128xf32> to vector<2x128xf32>
    %9 = arith.addf %6, %8 : vector<2x128xf32>
    %c0_10 = arith.constant 0 : index
    %c0_11 = arith.constant 0 : index
    %10 = vector.load %arg6[%c0_10, %c0_11] : memref<2x128xf32, #tpu.memory_space<vmem>>, vector<2x128xf32>
    tpu.vector_store %arg6[%c0_10, %c0_11], %9 {strides = array<i32>} : memref<2x128xf32, #tpu.memory_space<vmem>>, vector<2x128xf32>,
    return
  }
  func.func @transform_0(%arg0: i32) -> (i32, i32) {
    %c0_i32 = arith.constant 0 : i32
    %c0_i32_0 = arith.constant 0 : i32
    %c0_i32_1 = arith.constant 0 : i32
    return %c0_i32, %c0_i32_0 : i32, i32
  }
  func.func @transform_1(%arg0: i32) -> (i32, i32) {
    %c0_i32 = arith.constant 0 : i32
    %c0_i32_0 = arith.constant 0 : i32
    %c0_i32_1 = arith.constant 0 : i32
    return %c0_i32, %c0_i32_0 : i32, i32
  }
  func.func @transform_2(%arg0: i32) -> (i32, i32) {
    %c0_i32 = arith.constant 0 : i32
    %c0_i32_0 = arith.constant 0 : i32
    %c0_i32_1 = arith.constant 0 : i32
    return %c0_i32, %c0_i32_0 : i32, i32
  }
  func.func @transform_3(%arg0: i32) -> (i32, i32) {
    %c0_i32 = arith.constant 0 : i32
    %c0_i32_0 = arith.constant 0 : i32
    %c0_i32_1 = arith.constant 0 : i32
    return %c0_i32, %c0_i32_0 : i32, i32
  }
  func.func @transform_4(%arg0: i32) -> (i32, i32) {
    %c0_i32 = arith.constant 0 : i32
    %c0_i32_0 = arith.constant 0 : i32
    %c0_i32_1 = arith.constant 0 : i32
    return %c0_i32, %c0_i32_0 : i32, i32
  }
  func.func @transform_5(%arg0: i32) -> (i32, i32) {
    %c0_i32 = arith.constant 0 : i32
    %c0_i32_0 = arith.constant 0 : i32
    %c0_i32_1 = arith.constant 0 : i32
    return %c0_i32, %c0_i32_0 : i32, i32
  }
}

module attributes {stable_mosaic.version = 11 : i64} {
  func.func @_heads_kernel(%arg0: i32, %arg1: memref<8x128xbf16, #tpu.memory_space<vmem>>, %arg2: memref<128x128xbf16, #tpu.memory_space<vmem>>, %arg3: memref<1x128xf32, #tpu.memory_space<vmem>>, %arg4: memref<8x128xf32, #tpu.memory_space<vmem>>) attributes {dimension_semantics = [#tpu.dimension_semantics<arbitrary>], iteration_bounds = array<i64: 1>, scalar_prefetch = 0 : i64, scratch_operands = 0 : i64, tpu.core_type = #tpu.core_type<tc>, window_params = [{pipeline_mode = #tpu.pipeline_mode<synchronous>, transform_indices = @transform_0, window_bounds = array<i64: 8, 128>}, {pipeline_mode = #tpu.pipeline_mode<synchronous>, transform_indices = @transform_1, window_bounds = array<i64: 128, 128>}, {pipeline_mode = #tpu.pipeline_mode<synchronous>, transform_indices = @transform_2, window_bounds = array<i64: 1, 128>}, {pipeline_mode = #tpu.pipeline_mode<synchronous>, transform_indices = @transform_3, window_bounds = array<i64: 8, 128>}]} {
    %c0 = arith.constant 0 : index
    %c0_0 = arith.constant 0 : index
    %0 = vector.load %arg1[%c0, %c0_0] : memref<8x128xbf16, #tpu.memory_space<vmem>>, vector<8x128xbf16>
    %c0_1 = arith.constant 0 : index
    %c0_2 = arith.constant 0 : index
    %1 = vector.load %arg2[%c0_1, %c0_2] : memref<128x128xbf16, #tpu.memory_space<vmem>>, vector<128x128xbf16>
    %cst = arith.constant dense<0.000000e+00> : vector<8x128xf32>
    %2 = tpu.matmul %0, %1, %cst {dimension_numbers = #tpu.dot_dimension_numbers<[1], [0], [0], [1], [0, 0, 1, 1], [], []>} : vector<8x128xbf16>, vector<128x128xbf16>, vector<8x128xf32> -> vector<8x128xf32>
    %c0_3 = arith.constant 0 : index
    %c0_4 = arith.constant 0 : index
    %3 = vector.load %arg3[%c0_3, %c0_4] : memref<1x128xf32, #tpu.memory_space<vmem>>, vector<1x128xf32>
    %4 = vector.broadcast %3 : vector<1x128xf32> to vector<8x128xf32>
    %5 = arith.addf %2, %4 : vector<8x128xf32>
    %c0_5 = arith.constant 0 : index
    %c0_6 = arith.constant 0 : index
    %6 = vector.load %arg4[%c0_5, %c0_6] : memref<8x128xf32, #tpu.memory_space<vmem>>, vector<8x128xf32>
    tpu.vector_store %arg4[%c0_5, %c0_6], %5 {strides = array<i32>} : memref<8x128xf32, #tpu.memory_space<vmem>>, vector<8x128xf32>,
    return
  }
  func.func @transform_0(%arg0: i32) -> (i32, i32) {
    %c0_i32 = arith.constant 0 : i32
    %c0_i32_0 = arith.constant 0 : i32
    %c0_i32_1 = arith.constant 0 : i32
    return %c0_i32, %c0_i32_0 : i32, i32
  }
  func.func @transform_1(%arg0: i32) -> (i32, i32) {
    %c0_i32 = arith.constant 0 : i32
    %c0_i32_0 = arith.constant 0 : i32
    %c0_i32_1 = arith.constant 0 : i32
    return %c0_i32, %c0_i32_0 : i32, i32
  }
  func.func @transform_2(%arg0: i32) -> (i32, i32) {
    %c0_i32 = arith.constant 0 : i32
    %c0_i32_0 = arith.constant 0 : i32
    %c0_i32_1 = arith.constant 0 : i32
    return %c0_i32, %c0_i32_0 : i32, i32
  }
  func.func @transform_3(%arg0: i32) -> (i32, i32) {
    %c0_i32 = arith.constant 0 : i32
    %c0_i32_0 = arith.constant 0 : i32
    %c0_i32_1 = arith.constant 0 : i32
    return %c0_i32, %c0_i32_0 : i32, i32
  }
}

module attributes {stable_mosaic.version = 11 : i64} {
  func.func @_heads_kernel(%arg0: i32, %arg1: memref<2x256xbf16, #tpu.memory_space<vmem>>, %arg2: memref<256x128xbf16, #tpu.memory_space<vmem>>, %arg3: memref<1x128xf32, #tpu.memory_space<vmem>>, %arg4: memref<2x128xf32, #tpu.memory_space<vmem>>) attributes {dimension_semantics = [#tpu.dimension_semantics<arbitrary>], iteration_bounds = array<i64: 1>, scalar_prefetch = 0 : i64, scratch_operands = 0 : i64, tpu.core_type = #tpu.core_type<tc>, window_params = [{pipeline_mode = #tpu.pipeline_mode<synchronous>, transform_indices = @transform_0, window_bounds = array<i64: 2, 256>}, {pipeline_mode = #tpu.pipeline_mode<synchronous>, transform_indices = @transform_1, window_bounds = array<i64: 256, 128>}, {pipeline_mode = #tpu.pipeline_mode<synchronous>, transform_indices = @transform_2, window_bounds = array<i64: 1, 128>}, {pipeline_mode = #tpu.pipeline_mode<synchronous>, transform_indices = @transform_3, window_bounds = array<i64: 2, 128>}]} {
    %c0 = arith.constant 0 : index
    %c0_0 = arith.constant 0 : index
    %0 = vector.load %arg1[%c0, %c0_0] : memref<2x256xbf16, #tpu.memory_space<vmem>>, vector<2x256xbf16>
    %c0_1 = arith.constant 0 : index
    %c0_2 = arith.constant 0 : index
    %1 = vector.load %arg2[%c0_1, %c0_2] : memref<256x128xbf16, #tpu.memory_space<vmem>>, vector<256x128xbf16>
    %cst = arith.constant dense<0.000000e+00> : vector<2x128xf32>
    %2 = tpu.matmul %0, %1, %cst {dimension_numbers = #tpu.dot_dimension_numbers<[1], [0], [0], [1], [0, 0, 1, 1], [], []>} : vector<2x256xbf16>, vector<256x128xbf16>, vector<2x128xf32> -> vector<2x128xf32>
    %c0_3 = arith.constant 0 : index
    %c0_4 = arith.constant 0 : index
    %3 = vector.load %arg3[%c0_3, %c0_4] : memref<1x128xf32, #tpu.memory_space<vmem>>, vector<1x128xf32>
    %4 = vector.broadcast %3 : vector<1x128xf32> to vector<2x128xf32>
    %5 = arith.addf %2, %4 : vector<2x128xf32>
    %c0_5 = arith.constant 0 : index
    %c0_6 = arith.constant 0 : index
    %6 = vector.load %arg4[%c0_5, %c0_6] : memref<2x128xf32, #tpu.memory_space<vmem>>, vector<2x128xf32>
    tpu.vector_store %arg4[%c0_5, %c0_6], %5 {strides = array<i32>} : memref<2x128xf32, #tpu.memory_space<vmem>>, vector<2x128xf32>,
    return
  }
  func.func @transform_0(%arg0: i32) -> (i32, i32) {
    %c0_i32 = arith.constant 0 : i32
    %c0_i32_0 = arith.constant 0 : i32
    %c0_i32_1 = arith.constant 0 : i32
    return %c0_i32, %c0_i32_0 : i32, i32
  }
  func.func @transform_1(%arg0: i32) -> (i32, i32) {
    %c0_i32 = arith.constant 0 : i32
    %c0_i32_0 = arith.constant 0 : i32
    %c0_i32_1 = arith.constant 0 : i32
    return %c0_i32, %c0_i32_0 : i32, i32
  }
  func.func @transform_2(%arg0: i32) -> (i32, i32) {
    %c0_i32 = arith.constant 0 : i32
    %c0_i32_0 = arith.constant 0 : i32
    %c0_i32_1 = arith.constant 0 : i32
    return %c0_i32, %c0_i32_0 : i32, i32
  }
  func.func @transform_3(%arg0: i32) -> (i32, i32) {
    %c0_i32 = arith.constant 0 : i32
    %c0_i32_0 = arith.constant 0 : i32
    %c0_i32_1 = arith.constant 0 : i32
    return %c0_i32, %c0_i32_0 : i32, i32
  }
}

</mosaic_0001>

<bundles_post_ra>
// kernel: forward.7
= control target key start
LH: loop header
LB: loop body
LE: loop exit
PB: predicated region body
PF: predicated region fallthrough
CT: control target
= control target key end

     0   :  { %v180_v0 = vmov 0.0   ;;  %vm181_vm0 = vmmov 0   ;;  %s235_s1 = inlined_call_operand.vmem [shape: bf16[128,128], index: 1, kind: input, shape index: {}]   ;;  %s236_s0 = inlined_call_operand.vmem [shape: bf16[8,128], index: 0, kind: input, shape index: {}]   ;;  %s237_s2 = inlined_call_operand.vmem [shape: f32[1,128], index: 2, kind: input, shape index: {}]   ;;  %s238_s3 = inlined_call_operand.vmem [shape: f32[8,128], index: 3, kind: output, shape index: {}]  }
   0x1   :  { %150 = vmatprep.subr.bf16.mxu0 %v180_v0  ;;  %v172_v1 = vld [vmem:[%s235_s1 + $0x38] sm:$0xff]   ;;  %166 = vmatprep.mubr.msk.bf16.mxu0 %vm181_vm0, %v180_v0  ;;  %v173_v2 = vld [vmem:[%s235_s1 + $0x30] sm:$0xff]   ;;  %v174_v3 = vld [vmem:[%s235_s1 + $0x28] sm:$0xff]  }
   0x2   :  { %151 = vmatpush3.bf16.msra.mxu0 %v172_v1  ;;  %v175_v4 = vld [vmem:[%s235_s1 + $0x20] sm:$0xff]   ;;  %v176_v5 = vld [vmem:[%s235_s1 + $0x18] sm:$0xff]   ;;  %v177_v6 = vld [vmem:[%s235_s1 + $0x10] sm:$0xff]  }
   0x3   :  { %152 = vmatprep.subr.bf16.mxu0 %v180_v0  ;;  %v178_v7 = vld [vmem:[%s235_s1 + $0x8] sm:$0xff]   ;;  %v179_v8 = vld [vmem:[%s235_s1] sm:$0xff]  }
   0x4   :  { %v15_v9 = vld [vmem:[%s236_s0] sm:$0xf] }
   0x5   :  { %v132_v10 = vld [vmem:[%s237_s2] ss:$0 sm:$0xff] }
   0x6   :  { %153 = vmatpush3.bf16.msra.mxu0 %v173_v2 }
   0x7   :  { %154 = vmatprep.subr.bf16.mxu0 %v180_v0 }
   0xa   :  { %155 = vmatpush3.bf16.msra.mxu0 %v174_v3 }
   0xb   :  { %156 = vmatprep.subr.bf16.mxu0 %v180_v0 }
   0xe   :  { %157 = vmatpush3.bf16.msra.mxu0 %v175_v4 }
   0xf   :  { %158 = vmatprep.subr.bf16.mxu0 %v180_v0 }
  0x12   :  { %159 = vmatpush3.bf16.msra.mxu0 %v176_v5 }
  0x13   :  { %160 = vmatprep.subr.bf16.mxu0 %v180_v0 }
  0x16   :  { %161 = vmatpush3.bf16.msra.mxu0 %v177_v6 }
  0x17   :  { %162 = vmatprep.subr.bf16.mxu0 %v180_v0 }
  0x1a   :  { %163 = vmatpush3.bf16.msra.mxu0 %v178_v7 }
  0x1b   :  { %164 = vmatprep.subr.bf16.mxu0 %v180_v0 }
  0x1e   :  { %165 = vmatpush3.bf16.msra.mxu0 %v179_v8 }
  0x21   :  { %167 = vmatmul.mubr.bf16.vlgmr.msra.gmra.mxu0 %v15_v9 }
  0xe1   :  { %v121_v11 = vpop.f32.mrf.mxu0 }
  0xe2   :  { %v122_v12 = vadd.f32 %v132_v10, %v121_v11 }
  0xe3   :  { %v168_v13 = vpop.f32.mrf.mxu0 }
  0xe4   :  { %127 = vst [vmem:[%s238_s3] sm:$0xff] %v122_v12 }
  0xe5   :  { %v124_v14 = vpop.f32.mrf.mxu0 }
  0xe7   :  { %v169_v15 = vpop.f32.mrf.mxu0 }

// kernel: forward.5
= control target key start
LH: loop header
LB: loop body
LE: loop exit
PB: predicated region body
PF: predicated region fallthrough
CT: control target
= control target key end

     0   :  { %vm42_vm0 = vcmask 1043456   ;;  %v246_v0 = vmov 0.0   ;;  %vm247_vm1 = vmmov 0   ;;  %vm38_vm2 = vcmask 64512   ;;  %s327_s1 = inlined_call_operand.vmem [shape: bf16[8,128], index: 1, kind: input, shape index: {}]   ;;  %s328_s0 = inlined_call_operand.vmem [shape: bf16[8,8], index: 0, kind: input, shape index: {}]   ;;  %s329_s5 = inlined_call_operand.vmem [shape: bf16[16,128], index: 5, kind: input, shape index: {}]   ;;  %s330_s4 = inlined_call_operand.vmem [shape: bf16[2,16], index: 4, kind: input, shape index: {}]   ;;  %s331_s2 = inlined_call_operand.vmem [shape: f32[1,128], index: 2, kind: input, shape index: {}]   ;;  %s332_s7 = inlined_call_operand.vmem [shape: bf16[8,128], index: 7, kind: output, shape index: {0}]   ;;  %s333_s3 = inlined_call_operand.vmem [shape: bf16[2,8], index: 3, kind: input, shape index: {}]   ;;  %s334_s6 = inlined_call_operand.vmem [shape: f32[1,128], index: 6, kind: input, shape index: {}]   ;;  %s335_s8 = inlined_call_operand.vmem [shape: bf16[2,256], index: 8, kind: output, shape index: {1}]  }
   0x1   :  { %225 = vmatprep.subr.bf16.mxu0 %v246_v0  ;;  %v30_v1 = vld [vmem:[%s327_s1] sm:$0xf]  ;;  %227 = vmatprep.mubr.msk.bf16.mxu0 %vm247_vm1, %v246_v0  ;;  %vm154_vm3 = vcmask 130048  }
   0x2   :  { %v44_v2 = vsel %vm42_vm0, %v30_v1, 0  ;;  %231 = vmatprep.subr.bf16.mxu1 %v246_v0  ;;  %233 = vmatprep.mubr.msk.bf16.mxu1 %vm247_vm1, %v246_v0  ;;  %v29_v3 = vld [vmem:[%s328_s0] sm:$0xf] }
   0x3   :  { %226 = vmatpush3.bf16.msra.mxu0 %v44_v2  ;;  %v245_v4 = vld [vmem:[%s329_s5] sm:$0xff]  }
   0x4   :  { %237 = vmatprep.subr.bf16.mxu0 %v246_v0  ;;  %v138_v5 = vld [vmem:[%s330_s4] sm:$0x1] }
   0x5   :  { %v213_v6 = vld [vmem:[%s331_s2] ss:$0 sm:$0xff] }
   0x6   :  { %228 = vmatmul.mubr.msk.bf16.vlgmr.msra.gmra.mxu0 %vm38_vm2, %v29_v3  ;;  %v91_v16 = vld [vmem:[%s333_s3] sm:$0x1] }
   0x7   :  { %239 = vmatprep.mubr.msk.bf16.mxu0 %vm247_vm1, %v246_v0  ;;  %238 = vmatpush3.bf16.msra.mxu0 %v245_v4  ;;  %v216_v17 = vld [vmem:[%s334_s6] ss:$0 sm:$0xff] }
   0xe   :  { %240 = vmatmul.mubr.msk.bf16.vlgmr.msra.gmra.mxu0 %vm154_vm3, %v138_v5 }
  0xc6   :  { %v80_v7 = vpop.f32.mrf.mxu0 }
  0xc7   :  { %v81_v8 = vadd.f32 %v213_v6, %v80_v7 }
  0xc8   :  { %v229_v9 = vpop.f32.mrf.mxu0 }
  0xc9   :  { %v87_v10 = vmul.f32 0.01, %v81_v8  ;;  %vm86_vm4 = vcmp.gt.f32.partialorder %v81_v8, 0.0 }
  0xca   :  { %v83_v11 = vpop.f32.mrf.mxu0 }
  0xcb   :  { %v88_v12 = vsel %vm86_vm4, %v81_v8, %v87_v10 }
  0xcc   :  { %v230_v13 = vpop.f32.mrf.mxu0  ;;  %v89_v14 = vpack.c.bf16 %v88_v12, %v88_v12 }
  0xce   :  { %90 = vst [vmem:[%s332_s7] sm:$0xf] %v89_v14  ;;  %v96_v15 = vsel %vm42_vm0, %v89_v14, 0  ;;  %v192_v18 = vpop.f32.mrf.mxu0 }
  0xcf   :  { %232 = vmatpush3.bf16.msra.mxu1 %v96_v15  ;;  %v193_v19 = vadd.f32 %v216_v17, %v192_v18 }
  0xd0   :  { %v241_v20 = vpop.f32.mrf.mxu0 }
  0xd1   :  { %vm198_vm5 = vcmp.gt.f32.partialorder %v193_v19, 0.0  ;;  %v199_v21 = vmul.f32 0.01, %v193_v19 }
  0xd2   :  { %234 = vmatmul.mubr.msk.bf16.vlgmr.msra.gmra.mxu1 %vm38_vm2, %v91_v16  ;;  %v195_v22 = vpop.f32.mrf.mxu0 }
  0xd3   :  { %v200_v23 = vsel %vm198_vm5, %v193_v19, %v199_v21 }
  0xd4   :  { %v203_v24 = vpack.c.bf16 %v200_v23, %v200_v23  ;;  %v242_v25 = vpop.f32.mrf.mxu0 }
  0xd6   :  { %204 = vst [vmem:[%s335_s8 + $0x1] sm:$0x1] %v203_v24 }
 0x192   :  { %v132_v26 = vpop.f32.mrf.mxu1 }
 0x193   :  { %v201_v27 = vpack.c.bf16 %v132_v26, %v132_v26 }
 0x194   :  { %v235_v28 = vpop.f32.mrf.mxu1 }
 0x195   :  { %202 = vst [vmem:[%s335_s8] sm:$0x1] %v201_v27 }
 0x196   :  { %v135_v29 = vpop.f32.mrf.mxu1 }
 0x198   :  { %v236_v30 = vpop.f32.mrf.mxu1 }

// kernel: forward.8
= control target key start
LH: loop header
LB: loop body
LE: loop exit
PB: predicated region body
PF: predicated region fallthrough
CT: control target
= control target key end

     0   :  { %10 = vsyncpa [#allocation3], 0  ;;  %s501_s0 = inlined_call_operand.vmem [shape: bf16[3,128], index: 0, kind: input, shape index: {}]   ;;  %s502_s1 = inlined_call_operand.vmem [shape: bf16[3,128], index: 1, kind: input, shape index: {}]   ;;  %s503_s2 = inlined_call_operand.vmem [shape: bf16[128,128], index: 2, kind: input, shape index: {}]   ;;  %s504_s3 = inlined_call_operand.vmem [shape: bf16[128,128], index: 3, kind: input, shape index: {}]   ;;  %s505_s4 = inlined_call_operand.hbm [shape: f32[1,128], index: 4, kind: input, shape index: {}]   ;;  %s506_s5 = inlined_call_operand.hbm [shape: f32[3,128], index: 5, kind: output, shape index: {}]  }
   0x1   :  { %11 = vsyncpa [#allocation4], 0  ;;  %s407_s18 = smov [#allocation2]  }
   0x2   :  { %s26_s19 = sshll.u32 %s407_s18, 4  ;;  %s27_s19 = int_to_ptr.vmem [resolvable:$true] %s26_s19 }
   0x3   :  { %s371_s20 = scalar_lea.vmem %s27_s19, 16  ;;  %s375_s21 = scalar_lea.vmem %s27_s19, 32 }
   0x4   :  { %p372_p0 = scmp.ne.s32.totalorder %s27_s19, %s371_s20  ;;  %p376_p1 = scmp.lt.s32.totalorder %s27_s19, %s27_s19 }
   0x5   :  { %p377_p2 = scmp.lt.s32.totalorder %s375_s21, %s371_s20 }
   0x7   :  { %p378_p3 = por %p377_p2, %p376_p1 }
   0x9   :  { %p379_p4 = pnand %p378_p3, %p372_p0 }
   0xb   :  { %382 = shalt.err (!%p379_p4)
}
   0xc   :  { %29 = dma.hbm_to_vmem [thread:$0]  %s505_s4, 16, %s27_s19, [#allocation3]  }
   0xd   :  { %403 = dma.done.wait [#allocation3], 16  }
   0xe   :  { %404 = vsyncadd [#allocation3], 4294967280  ;;  %v408_v0 = vmov 0.0   ;;  %vm409_vm0 = vmmov 0   ;;  %v347_v1 = vld [vmem:[%s504_s3 + $0x38] sm:$0xff]   ;;  %v349_v3 = vld [vmem:[%s504_s3 + $0x30] sm:$0xff]  }
   0xf   :  { %303 = vmatprep.subr.bf16.mxu0 %v408_v0  ;;  %323 = vmatprep.subr.bf16.mxu1 %v408_v0  ;;  %v348_v2 = vld [vmem:[%s503_s2 + $0x38] sm:$0xff]   ;;  %v350_v4 = vld [vmem:[%s503_s2 + $0x30] sm:$0xff]   ;;  %v351_v5 = vld [vmem:[%s504_s3 + $0x28] sm:$0xff]  }
  0x10   :  { %319 = vmatprep.mubr.msk.bf16.mxu0 %vm409_vm0, %v408_v0  ;;  %339 = vmatprep.mubr.msk.bf16.mxu1 %vm409_vm0, %v408_v0  ;;  %v352_v6 = vld [vmem:[%s503_s2 + $0x28] sm:$0xff]   ;;  %v353_v7 = vld [vmem:[%s504_s3 + $0x20] sm:$0xff]   ;;  %v355_v9 = vld [vmem:[%s504_s3 + $0x18] sm:$0xff]  }
  0x11   :  { %304 = vmatpush3.bf16.msra.mxu0 %v347_v1  ;;  %324 = vmatpush3.bf16.msra.mxu1 %v348_v2  ;;  %v354_v8 = vld [vmem:[%s503_s2 + $0x20] sm:$0xff]   ;;  %v356_v10 = vld [vmem:[%s503_s2 + $0x18] sm:$0xff]   ;;  %v357_v11 = vld [vmem:[%s504_s3 + $0x10] sm:$0xff]  }
  0x12   :  { %305 = vmatprep.subr.bf16.mxu0 %v408_v0  ;;  %325 = vmatprep.subr.bf16.mxu1 %v408_v0  ;;  %v358_v12 = vld [vmem:[%s503_s2 + $0x10] sm:$0xff]   ;;  %v359_v13 = vld [vmem:[%s504_s3 + $0x8] sm:$0xff]   ;;  %v361_v15 = vld [vmem:[%s504_s3] sm:$0xff]   ;;  %s410_s3 = smov [#allocation5]  }
  0x13   :  { %v360_v14 = vld [vmem:[%s503_s2 + $0x8] sm:$0xff]   ;;  %v362_v16 = vld [vmem:[%s503_s2] sm:$0xff]   ;;  %s259_s8 = sshll.u32 %s410_s3, 4  ;;  %s260_s8 = int_to_ptr.vmem [resolvable:$true] %s259_s8 }
  0x14   :  { %v51_v17 = vld [vmem:[%s502_s1] sm:$0x3]  ;;  %s383_s1 = scalar_lea.vmem %s260_s8, 64  ;;  %p388_p6 = scmp.lt.s32.totalorder %s260_s8, %s260_s8 }
  0x15   :  { %306 = vmatpush3.bf16.msra.mxu0 %v349_v3  ;;  %326 = vmatpush3.bf16.msra.mxu1 %v350_v4  ;;  %v34_v18 = vld [vmem:[%s501_s0] sm:$0x3]  ;;  %p384_p5 = scmp.ne.s32.totalorder %s260_s8, %s383_s1  ;;  %p389_p7 = scmp.lt.s32.totalorder %s383_s1, %s383_s1 }
  0x16   :  { %307 = vmatprep.subr.bf16.mxu0 %v408_v0  ;;  %327 = vmatprep.subr.bf16.mxu1 %v408_v0  ;;  %v284_v21 = vld [vmem:[#allocation2] ss:$0 sm:$0xff] }
  0x17   :  { %p390_p8 = por %p389_p7, %p388_p6 }
  0x19   :  { %308 = vmatpush3.bf16.msra.mxu0 %v351_v5  ;;  %328 = vmatpush3.bf16.msra.mxu1 %v352_v6  ;;  %p391_p9 = pnand %p390_p8, %p384_p5 }
  0x1a   :  { %309 = vmatprep.subr.bf16.mxu0 %v408_v0  ;;  %329 = vmatprep.subr.bf16.mxu1 %v408_v0 }
  0x1d   :  { %310 = vmatpush3.bf16.msra.mxu0 %v353_v7  ;;  %330 = vmatpush3.bf16.msra.mxu1 %v354_v8 }
  0x1e   :  { %311 = vmatprep.subr.bf16.mxu0 %v408_v0  ;;  %331 = vmatprep.subr.bf16.mxu1 %v408_v0 }
  0x21   :  { %312 = vmatpush3.bf16.msra.mxu0 %v355_v9  ;;  %332 = vmatpush3.bf16.msra.mxu1 %v356_v10 }
  0x22   :  { %313 = vmatprep.subr.bf16.mxu0 %v408_v0  ;;  %333 = vmatprep.subr.bf16.mxu1 %v408_v0 }
  0x25   :  { %314 = vmatpush3.bf16.msra.mxu0 %v357_v11  ;;  %334 = vmatpush3.bf16.msra.mxu1 %v358_v12 }
  0x26   :  { %315 = vmatprep.subr.bf16.mxu0 %v408_v0  ;;  %335 = vmatprep.subr.bf16.mxu1 %v408_v0 }
  0x29   :  { %316 = vmatpush3.bf16.msra.mxu0 %v359_v13  ;;  %336 = vmatpush3.bf16.msra.mxu1 %v360_v14 }
  0x2a   :  { %317 = vmatprep.subr.bf16.mxu0 %v408_v0  ;;  %337 = vmatprep.subr.bf16.mxu1 %v408_v0 }
  0x2d   :  { %318 = vmatpush3.bf16.msra.mxu0 %v361_v15  ;;  %338 = vmatpush3.bf16.msra.mxu1 %v362_v16 }
  0x30   :  { %320 = vmatmul.mubr.bf16.vlgmr.msra.gmra.mxu0 %v51_v17  ;;  %340 = vmatmul.mubr.bf16.vlgmr.msra.gmra.mxu1 %v34_v18 }
  0xf0   :  { %v150_v19 = vpop.f32.mrf.mxu0  ;;  %v238_v20 = vpop.f32.mrf.mxu1 }
  0xf1   :  { %v239_v22 = vadd.f32 %v238_v20, %v150_v19 }
  0xf2   :  { %v321_v23 = vpop.f32.mrf.mxu0  ;;  %v341_v24 = vpop.f32.mrf.mxu1 }
  0xf3   :  { %v251_v25 = vadd.f32 %v284_v21, %v239_v22 }
  0xf4   :  { %v153_v26 = vpop.f32.mrf.mxu0  ;;  %v241_v27 = vpop.f32.mrf.mxu1 }
  0xf5   :  { %252 = vst [vmem:[#allocation5] sm:$0x7] %v251_v25 }
  0xf6   :  { %v322_v28 = vpop.f32.mrf.mxu0  ;;  %v342_v29 = vpop.f32.mrf.mxu1 }
  0xf7   :  { %394 = shalt.err (!%p391_p9)
}
  0xf8   :  { %262 = dma.vmem_to_hbm [thread:$0]  %s260_s8, 64, %s506_s5, [#allocation4]  }
  0xf9   :  { %405 = dma.done.wait [#allocation4], 64  }
  0xfa   :  { %406 = vsyncadd [#allocation4], 4294967232 }
  0xfb   :  { %266 = vsyncpa [#allocation3], 1 }
  0xfc   :  { %267 = vsyncpa [#allocation4], 1 }

// kernel: forward.9
= control target key start
LH: loop header
LB: loop body
LE: loop exit
PB: predicated region body
PF: predicated region fallthrough
CT: control target
= control target key end

     0   :  { %v337_v0 = vmov 0.0   ;;  %vm338_vm0 = vmmov 0   ;;  %s429_s3 = inlined_call_operand.vmem [shape: bf16[128,128], index: 3, kind: input, shape index: {}]   ;;  %s430_s2 = inlined_call_operand.vmem [shape: bf16[128,128], index: 2, kind: input, shape index: {}]   ;;  %s431_s1 = inlined_call_operand.vmem [shape: bf16[2,128], index: 1, kind: input, shape index: {}]   ;;  %s432_s0 = inlined_call_operand.vmem [shape: bf16[2,128], index: 0, kind: input, shape index: {}]   ;;  %s433_s4 = inlined_call_operand.vmem [shape: f32[1,128], index: 4, kind: input, shape index: {}]   ;;  %s434_s5 = inlined_call_operand.vmem [shape: f32[2,128], index: 5, kind: output, shape index: {}]  }
   0x1   :  { %279 = vmatprep.subr.bf16.mxu0 %v337_v0  ;;  %299 = vmatprep.subr.bf16.mxu1 %v337_v0  ;;  %v321_v1 = vld [vmem:[%s429_s3 + $0x38] sm:$0xff]   ;;  %v323_v3 = vld [vmem:[%s429_s3 + $0x30] sm:$0xff]   ;;  %v325_v5 = vld [vmem:[%s429_s3 + $0x28] sm:$0xff]  }
   0x2   :  { %v322_v2 = vld [vmem:[%s430_s2 + $0x38] sm:$0xff]   ;;  %295 = vmatprep.mubr.msk.bf16.mxu0 %vm338_vm0, %v337_v0  ;;  %315 = vmatprep.mubr.msk.bf16.mxu1 %vm338_vm0, %v337_v0  ;;  %v324_v4 = vld [vmem:[%s430_s2 + $0x30] sm:$0xff]   ;;  %v326_v6 = vld [vmem:[%s430_s2 + $0x28] sm:$0xff]  }
   0x3   :  { %280 = vmatpush3.bf16.msra.mxu0 %v321_v1  ;;  %300 = vmatpush3.bf16.msra.mxu1 %v322_v2  ;;  %v327_v7 = vld [vmem:[%s429_s3 + $0x20] sm:$0xff]   ;;  %v329_v9 = vld [vmem:[%s429_s3 + $0x18] sm:$0xff]   ;;  %v331_v11 = vld [vmem:[%s429_s3 + $0x10] sm:$0xff]  }
   0x4   :  { %281 = vmatprep.subr.bf16.mxu0 %v337_v0  ;;  %301 = vmatprep.subr.bf16.mxu1 %v337_v0  ;;  %v328_v8 = vld [vmem:[%s430_s2 + $0x20] sm:$0xff]   ;;  %v330_v10 = vld [vmem:[%s430_s2 + $0x18] sm:$0xff]   ;;  %v332_v12 = vld [vmem:[%s430_s2 + $0x10] sm:$0xff]  }
   0x5   :  { %v333_v13 = vld [vmem:[%s429_s3 + $0x8] sm:$0xff]   ;;  %v335_v15 = vld [vmem:[%s429_s3] sm:$0xff]  }
   0x6   :  { %v334_v14 = vld [vmem:[%s430_s2 + $0x8] sm:$0xff]   ;;  %v336_v16 = vld [vmem:[%s430_s2] sm:$0xff]  }
   0x7   :  { %282 = vmatpush3.bf16.msra.mxu0 %v323_v3  ;;  %302 = vmatpush3.bf16.msra.mxu1 %v324_v4  ;;  %v38_v17 = vld [vmem:[%s431_s1] sm:$0x1] }
   0x8   :  { %283 = vmatprep.subr.bf16.mxu0 %v337_v0  ;;  %303 = vmatprep.subr.bf16.mxu1 %v337_v0  ;;  %v21_v18 = vld [vmem:[%s432_s0] sm:$0x1] }
   0x9   :  { %v260_v21 = vld [vmem:[%s433_s4] ss:$0 sm:$0xff] }
   0xb   :  { %284 = vmatpush3.bf16.msra.mxu0 %v325_v5  ;;  %304 = vmatpush3.bf16.msra.mxu1 %v326_v6 }
   0xc   :  { %285 = vmatprep.subr.bf16.mxu0 %v337_v0  ;;  %305 = vmatprep.subr.bf16.mxu1 %v337_v0 }
   0xf   :  { %286 = vmatpush3.bf16.msra.mxu0 %v327_v7  ;;  %306 = vmatpush3.bf16.msra.mxu1 %v328_v8 }
  0x10   :  { %287 = vmatprep.subr.bf16.mxu0 %v337_v0  ;;  %307 = vmatprep.subr.bf16.mxu1 %v337_v0 }
  0x13   :  { %288 = vmatpush3.bf16.msra.mxu0 %v329_v9  ;;  %308 = vmatpush3.bf16.msra.mxu1 %v330_v10 }
  0x14   :  { %289 = vmatprep.subr.bf16.mxu0 %v337_v0  ;;  %309 = vmatprep.subr.bf16.mxu1 %v337_v0 }
  0x17   :  { %290 = vmatpush3.bf16.msra.mxu0 %v331_v11  ;;  %310 = vmatpush3.bf16.msra.mxu1 %v332_v12 }
  0x18   :  { %291 = vmatprep.subr.bf16.mxu0 %v337_v0  ;;  %311 = vmatprep.subr.bf16.mxu1 %v337_v0 }
  0x1b   :  { %292 = vmatpush3.bf16.msra.mxu0 %v333_v13  ;;  %312 = vmatpush3.bf16.msra.mxu1 %v334_v14 }
  0x1c   :  { %293 = vmatprep.subr.bf16.mxu0 %v337_v0  ;;  %313 = vmatprep.subr.bf16.mxu1 %v337_v0 }
  0x1f   :  { %294 = vmatpush3.bf16.msra.mxu0 %v335_v15  ;;  %314 = vmatpush3.bf16.msra.mxu1 %v336_v16 }
  0x22   :  { %296 = vmatmul.mubr.bf16.vlgmr.msra.gmra.mxu0 %v38_v17  ;;  %316 = vmatmul.mubr.bf16.vlgmr.msra.gmra.mxu1 %v21_v18 }
  0xe2   :  { %v137_v19 = vpop.f32.mrf.mxu0  ;;  %v225_v20 = vpop.f32.mrf.mxu1 }
  0xe3   :  { %v226_v22 = vadd.f32 %v225_v20, %v137_v19 }
  0xe4   :  { %v297_v23 = vpop.f32.mrf.mxu0  ;;  %v317_v24 = vpop.f32.mrf.mxu1 }
  0xe5   :  { %v238_v25 = vadd.f32 %v260_v21, %v226_v22 }
  0xe6   :  { %v140_v26 = vpop.f32.mrf.mxu0  ;;  %v228_v27 = vpop.f32.mrf.mxu1 }
  0xe7   :  { %239 = vst [vmem:[%s434_s5] sm:$0x3] %v238_v25 }
  0xe8   :  { %v298_v28 = vpop.f32.mrf.mxu0  ;;  %v318_v29 = vpop.f32.mrf.mxu1 }

// kernel: forward.6
= control target key start
LH: loop header
LB: loop body
LE: loop exit
PB: predicated region body
PF: predicated region fallthrough
CT: control target
= control target key end

     0   :  { %v278_v6 = vmov 1966171168   ;;  %v67_v8 = vlaneseq  ;;  %s356_s1 = inlined_call_operand.vmem [shape: bf16[256,128], index: 1, kind: input, shape index: {}]   ;;  %s357_s0 = inlined_call_operand.vmem [shape: bf16[2,256], index: 0, kind: input, shape index: {}]   ;;  %s358_s2 = inlined_call_operand.vmem [shape: f32[1,128], index: 2, kind: input, shape index: {}]   ;;  %s359_s3 = inlined_call_operand.vmem [shape: f32[2,128], index: 3, kind: output, shape index: {}]  }
   0x1   :  { %v262_v0 = vld [vmem:[%s356_s1 + $0x78] sm:$0xff]   ;;  %v264_v2 = vld [vmem:[%s356_s1 + $0x70] sm:$0xff]   ;;  %v266_v4 = vld [vmem:[%s356_s1 + $0x68] sm:$0xff]   ;;  %v65_v7 = vunpack.c.l.s4 %v278_v6 }
   0x2   :  { %v263_v1 = vld [vmem:[%s356_s1 + $0x38] sm:$0xff]   ;;  %239 = vmatprep.subr.bf16.mxu0 %v262_v0  ;;  %v265_v3 = vld [vmem:[%s356_s1 + $0x30] sm:$0xff]   ;;  %v267_v5 = vld [vmem:[%s356_s1 + $0x28] sm:$0xff]   ;;  %v68_v12 = vshrl.u32 %v67_v8, 7 }
   0x3   :  { %240 = vmatpush3.bf16.msra.mxu0 %v263_v1  ;;  %v268_v9 = vld [vmem:[%s356_s1 + $0x60] sm:$0xff]   ;;  %v66_v11 = vunpack.c.0.s8 %v65_v7  ;;  %v270_v13 = vld [vmem:[%s356_s1 + $0x58] sm:$0xff]   ;;  %v272_v16 = vld [vmem:[%s356_s1 + $0x50] sm:$0xff]  }
   0x4   :  { %241 = vmatprep.subr.bf16.mxu0 %v264_v2  ;;  %v269_v10 = vld [vmem:[%s356_s1 + $0x20] sm:$0xff]   ;;  %v271_v14 = vld [vmem:[%s356_s1 + $0x18] sm:$0xff]   ;;  %v273_v19 = vld [vmem:[%s356_s1 + $0x10] sm:$0xff]  }
   0x5   :  { %v69_v15 = vsub.s32 %v66_v11, %v68_v12  ;;  %v222_v17 = vld.sshfl [vmem:[%s357_s0] sm:$0x11 pattern:$0x75316420]  ;;  %v274_v21 = vld [vmem:[%s356_s1 + $0x48] sm:$0xff]  }
   0x6   :  { %v63_v18 = vcombine.high %v222_v17, %v222_v17  ;;  %v275_v22 = vld [vmem:[%s356_s1 + $0x8] sm:$0xff]   ;;  %v276_v23 = vld [vmem:[%s356_s1 + $0x40] sm:$0xff]  }
   0x7   :  { %242 = vmatpush3.bf16.msra.mxu0 %v265_v3  ;;  %v277_v24 = vld [vmem:[%s356_s1] sm:$0xff]   ;;  %v70_v25 = vrot.slane %v222_v17, %v69_v15 }
   0x8   :  { %243 = vmatprep.subr.bf16.mxu0 %v266_v4  ;;  %v77_v20 = vrot.slane %v63_v18, %v69_v15  ;;  %v221_v27 = vld [vmem:[%s358_s2] ss:$0 sm:$0xff] }
   0xa   :  { %208 = vmatprep.mubr.bf16.mxu0 %v77_v20 }
   0xb   :  { %244 = vmatpush3.bf16.msra.mxu0 %v267_v5 }
   0xc   :  { %245 = vmatprep.subr.bf16.mxu0 %v268_v9 }
   0xf   :  { %246 = vmatpush3.bf16.msra.mxu0 %v269_v10 }
  0x10   :  { %247 = vmatprep.subr.bf16.mxu0 %v270_v13 }
  0x13   :  { %248 = vmatpush3.bf16.msra.mxu0 %v271_v14 }
  0x14   :  { %249 = vmatprep.subr.bf16.mxu0 %v272_v16 }
  0x17   :  { %250 = vmatpush3.bf16.msra.mxu0 %v273_v19 }
  0x18   :  { %251 = vmatprep.subr.bf16.mxu0 %v274_v21 }
  0x1b   :  { %252 = vmatpush3.bf16.msra.mxu0 %v275_v22 }
  0x1c   :  { %253 = vmatprep.subr.bf16.mxu0 %v276_v23 }
  0x1f   :  { %254 = vmatpush3.bf16.msra.mxu0 %v277_v24 }
  0x22   :  { %209 = vmatmul.mubr.bf16.vlgmr.msra.gmra.mxu0 %v70_v25 }
  0xe2   :  { %v255_v26 = vpop.f32.mrf.mxu0 }
  0xe4   :  { %v256_v28 = vpop.f32.mrf.mxu0 }
  0xe5   :  { %v257_v29 = vadd.f32 %v256_v28, %v255_v26 }
  0xe6   :  { %v258_v30 = vpop.f32.mrf.mxu0 }
  0xe7   :  { %v211_v31 = vadd.f32 %v257_v29, %v221_v27 }
  0xe8   :  { %v259_v32 = vpop.f32.mrf.mxu0 }
  0xe9   :  { %216 = vst [vmem:[%s359_s3] sm:$0x3] %v211_v31 }

</bundles_post_ra>
